<compile_context>
chip_gen: v7x
topology: tpu7x:2x2x1
jax: 0.10.0
libtpu: 0.0.40
codegen_flags: <defaults>
</compile_context>

<pallas_src>
import functools

import jax
import jax.numpy as jnp
from jax.experimental import pallas as pl
from jax.experimental.pallas import tpu as pltpu


def _bayes_conv1d_kernel(
    x_ref,     # (B_tile, L_eff, stride*C_in)  NLC, stride-phase-decomposed
    w_ref,     # (K*C_in_g, C_out)             sampled weight, C_in_g-minor rows
    b_ref,     # (1, C_out)                    sampled bias
    out_ref,   # (B_tile, L_out, C_out)
    *,
    kernel_size: int,
    stride: int,
    dilation: int,
    groups: int,
    c_in: int,
    c_in_g: int,
    c_out: int,
    l_out: int,
    b_tile: int,
):
    x = x_ref[...]
    w = w_ref[...]
    b = b_ref[...]
    cpg = c_out // groups

    ys = []
    for g in range(groups):
        # Build the im2col block for this group: (B_tile, L_out, K*C_in_g).
        # Every tap is a contiguous static slice thanks to the wrapper-side
        # stride-phase decomposition (row offset q0, lane offset p*C_in).
        cols = []
        for k in range(kernel_size):
            off = k * dilation
            q0 = off // stride
            p = off % stride
            lane0 = p * c_in + g * c_in_g
            cols.append(x[:, q0:q0 + l_out, lane0:lane0 + c_in_g])
        xcol = cols[0] if kernel_size == 1 else jnp.concatenate(cols, axis=-1)
        xcol2 = xcol.reshape(b_tile * l_out, kernel_size * c_in_g)

        # Single MXU matmul: (B_tile*L_out, K*C_in_g) @ (K*C_in_g, cpg).
        y = jnp.dot(xcol2, w[:, g * cpg:(g + 1) * cpg],
                    preferred_element_type=jnp.float32)
        y = y + b[:, g * cpg:(g + 1) * cpg]
        ys.append(y.reshape(b_tile, l_out, cpg).astype(out_ref.dtype))

    # One lane-dense store covering all output channels.
    out_ref[...] = ys[0] if groups == 1 else jnp.concatenate(ys, axis=-1)


def _choose_batch_tile(n, l_out, l_eff, lanes_in, c_out, itemsize):
    """Pick a batch tile: ~512 GEMM rows/step, >=2 grid steps, VMEM-bounded."""
    target_rows = 512
    bt = max(1, min(n, pl.cdiv(target_rows, max(l_out, 1))))
    if n >= 2:
        bt = min(bt, pl.cdiv(n, 2))          # keep >= 2 grid steps
    per_batch = (l_eff * lanes_in + l_out * c_out) * itemsize
    budget = 8 * 1024 * 1024                 # per-buffer budget (double-buffered)
    bt = max(1, min(bt, budget // max(per_batch, 1)))
    if l_out % 8 != 0:                        # keep the row-merge reshape trivial
        bt = 1
    return int(bt)


def bayes_conv1d(
    x, weight_mu, weight_sigma, bias_mu=None, bias_sigma=None, *,
    stride=1, padding=0, dilation=1, groups=1,
    frozen=False, rng_key=None, b_tile=None,
):
    """Forward pass of BayesConv1d. x: (N, C_in, L), NCL layout like PyTorch."""
    n, c_in, length = x.shape
    c_out, c_in_g, k = weight_mu.shape
    assert c_in_g == c_in // groups
    assert c_out % groups == 0

    # ---- sample the posterior ONCE, outside the kernel (stable softplus) ----
    if frozen or rng_key is None:
        w = weight_mu
        b = bias_mu if bias_mu is not None else jnp.zeros((c_out,), x.dtype)
    else:
        kw, kb = jax.random.split(rng_key)
        w_eps = jax.random.normal(kw, weight_mu.shape, weight_mu.dtype)
        w = weight_mu + jax.nn.softplus(weight_sigma) * w_eps
        if bias_mu is not None:
            b_eps = jax.random.normal(kb, bias_mu.shape, bias_mu.dtype)
            b = bias_mu + jax.nn.softplus(bias_sigma) * b_eps
        else:
            b = jnp.zeros((c_out,), x.dtype)

    # ---- output geometry (padding_mode='zeros' only) ----
    l_pad = length + 2 * padding
    l_out = (l_pad - dilation * (k - 1) - 1) // stride + 1
    assert l_out >= 1

    # ---- wrapper-side layout plumbing (cheap XLA ops) ----
    # Stride-phase decomposition: x_nlc[n, q, p*C_in + c] == x_pad[n, c, q*stride + p]
    l_pad_s = pl.cdiv(l_pad, stride) * stride
    l_eff = l_pad_s // stride
    lanes_in = stride * c_in

    itemsize = jnp.dtype(x.dtype).itemsize
    if b_tile is None:
        b_tile = _choose_batch_tile(n, l_out, l_eff, lanes_in, c_out, itemsize)
    n_pad = pl.cdiv(n, b_tile) * b_tile

    x_p = jnp.pad(x, ((0, n_pad - n), (0, 0),
                      (padding, l_pad_s - length - padding)))
    x_nlc = jnp.transpose(x_p, (0, 2, 1)).reshape(n_pad, l_eff, lanes_in)

    # Weight -> (K*C_in_g, C_out); contraction row index = k*C_in_g + c.
    w2 = jnp.transpose(w, (2, 1, 0)).reshape(k * c_in_g, c_out)
    b2 = b.reshape(1, c_out)

    kernel = functools.partial(
        _bayes_conv1d_kernel,
        kernel_size=k, stride=stride, dilation=dilation, groups=groups,
        c_in=c_in, c_in_g=c_in_g, c_out=c_out, l_out=l_out, b_tile=b_tile,
    )

    flops = int(2 * n * l_out * c_out * c_in_g * k)
    bytes_accessed = int(itemsize * (
        x_nlc.size + w2.size + b2.size + n_pad * l_out * c_out))

    out_nlc = pl.pallas_call(
        kernel,
        out_shape=jax.ShapeDtypeStruct((n_pad, l_out, c_out), x.dtype),
        grid=(n_pad // b_tile,),
        in_specs=[
            pl.BlockSpec((b_tile, l_eff, lanes_in), lambda i: (i, 0, 0)),
            pl.BlockSpec((k * c_in_g, c_out), lambda i: (0, 0)),
            pl.BlockSpec((1, c_out), lambda i: (0, 0)),
        ],
        out_specs=pl.BlockSpec((b_tile, l_out, c_out), lambda i: (i, 0, 0)),
        compiler_params=pltpu.CompilerParams(
            dimension_semantics=("parallel",),
            vmem_limit_bytes=32 * 1024 * 1024,
        ),
        cost_estimate=pl.CostEstimate(
            flops=flops, transcendentals=0, bytes_accessed=bytes_accessed),
    )(x_nlc, w2, b2)

    # Back to PyTorch NCL layout (wrapper-side layout plumbing).
    return jnp.transpose(out_nlc[:n], (0, 2, 1))


def _reference_conv1d(x, w, b, stride, padding, dilation, groups):
    out = jax.lax.conv_general_dilated(
        x, w,
        window_strides=(stride,),
        padding=[(padding, padding)],
        rhs_dilation=(dilation,),
        dimension_numbers=("NCH", "OIH", "NCH"),
        feature_group_count=groups,
    )
    return out + b[None, :, None]


def _run_case(key, *, batch, length, c_in, c_out, k, stride, padding,
              dilation, groups, mu_init=0.0, sigma_init=-6.0):
    k1, k2, k3, k4, k5, k6 = jax.random.split(key, 6)
    wshape = (c_out, c_in // groups, k)
    weight_mu = mu_init + 0.1 * jax.random.normal(k1, wshape, jnp.float32)
    weight_sigma = sigma_init + 0.1 * jax.random.normal(k2, wshape, jnp.float32)
    bias_mu = mu_init + 0.1 * jax.random.normal(k3, (c_out,), jnp.float32)
    bias_sigma = sigma_init + 0.1 * jax.random.normal(k4, (c_out,), jnp.float32)
    x = jax.random.normal(k5, (batch, c_in, length), jnp.float32)

    # Sampled (training) path.
    out = jax.block_until_ready(bayes_conv1d(
        x, weight_mu, weight_sigma, bias_mu, bias_sigma,
        stride=stride, padding=padding, dilation=dilation, groups=groups,
        frozen=False, rng_key=k6))
    kw, kb = jax.random.split(k6)
    w_eps = jax.random.normal(kw, wshape, jnp.float32)
    b_eps = jax.random.normal(kb, (c_out,), jnp.float32)
    w_s = weight_mu + jax.nn.softplus(weight_sigma) * w_eps
    b_s = bias_mu + jax.nn.softplus(bias_sigma) * b_eps
    ref = _reference_conv1d(x, w_s, b_s, stride, padding, dilation, groups)
    l_out = (length + 2 * padding - dilation * (k - 1) - 1) // stride + 1
    assert out.shape == (batch, c_out, l_out), out.shape
    assert jnp.allclose(out, ref, atol=1e-5, rtol=1e-5), float(
        jnp.max(jnp.abs(out - ref)))

    # Frozen path (posterior means, no sampling at all).
    out_f = jax.block_until_ready(bayes_conv1d(
        x, weight_mu, weight_sigma, bias_mu, bias_sigma,
        stride=stride, padding=padding, dilation=dilation, groups=groups,
        frozen=True))
    ref_f = _reference_conv1d(x, weight_mu, bias_mu, stride, padding,
                              dilation, groups)
    assert jnp.allclose(out_f, ref_f, atol=1e-5, rtol=1e-5)


if __name__ == "__main__":
    key = jax.random.PRNGKey(0)
    k_a, k_b = jax.random.split(key)

    # BayesConv1d(4, 8, kernel_size=3, stride=1, padding=1) on x = (2, 4, 16).
    _run_case(k_a, batch=2, length=16, c_in=4, c_out=8, k=3,
              stride=1, padding=1, dilation=1, groups=1)

    # Grouped / strided / dilated variant exercising the general GEMM path
    # (batch tile of 2 per grid step).
    _run_case(k_b, batch=4, length=32, c_in=8, c_out=16, k=3,
              stride=2, padding=2, dilation=2, groups=2)

    print("KERNEL_OK")
</pallas_src>

<mosaic_0001>
module attributes {stable_mosaic.version = 11 : i64} {
  func.func @_bayes_conv1d_kernel(%arg0: i32, %arg1: memref<1x18x4xf32, #tpu.memory_space<vmem>>, %arg2: memref<12x8xf32, #tpu.memory_space<vmem>>, %arg3: memref<1x8xf32, #tpu.memory_space<vmem>>, %arg4: memref<1x16x8xf32, #tpu.memory_space<vmem>>) attributes {dimension_semantics = [#tpu.dimension_semantics<parallel>], iteration_bounds = array<i64: 2>, scalar_prefetch = 0 : i64, scratch_operands = 0 : i64, tpu.core_type = #tpu.core_type<tc>, window_params = [{transform_indices = @transform_0, window_bounds = array<i64: 1, 18, 4>}, {pipeline_mode = #tpu.pipeline_mode<synchronous>, transform_indices = @transform_1, window_bounds = array<i64: 12, 8>}, {pipeline_mode = #tpu.pipeline_mode<synchronous>, transform_indices = @transform_2, window_bounds = array<i64: 1, 8>}, {transform_indices = @transform_3, window_bounds = array<i64: 1, 16, 8>}]} {
    %c0 = arith.constant 0 : index
    %c0_0 = arith.constant 0 : index
    %c0_1 = arith.constant 0 : index
    %0 = vector.load %arg1[%c0, %c0_0, %c0_1] : memref<1x18x4xf32, #tpu.memory_space<vmem>>, vector<1x18x4xf32>
    %c0_2 = arith.constant 0 : index
    %c0_3 = arith.constant 0 : index
    %1 = vector.load %arg2[%c0_2, %c0_3] : memref<12x8xf32, #tpu.memory_space<vmem>>, vector<12x8xf32>
    %c0_4 = arith.constant 0 : index
    %c0_5 = arith.constant 0 : index
    %2 = vector.load %arg3[%c0_4, %c0_5] : memref<1x8xf32, #tpu.memory_space<vmem>>, vector<1x8xf32>
    %3 = vector.extract_strided_slice %0 {offsets = [0, 0, 0], sizes = [1, 16, 4], strides = [1, 1, 1]} : vector<1x18x4xf32> to vector<1x16x4xf32>
    %4 = vector.extract_strided_slice %0 {offsets = [0, 1, 0], sizes = [1, 16, 4], strides = [1, 1, 1]} : vector<1x18x4xf32> to vector<1x16x4xf32>
    %5 = vector.extract_strided_slice %0 {offsets = [0, 2, 0], sizes = [1, 16, 4], strides = [1, 1, 1]} : vector<1x18x4xf32> to vector<1x16x4xf32>
    %6 = tpu.concatenate %3, %4, %5 in 2 : vector<1x16x4xf32>, vector<1x16x4xf32>, vector<1x16x4xf32> -> vector<1x16x12xf32>
    %7 = vector.shape_cast %6 : vector<1x16x12xf32> to vector<16x12xf32>
    %cst = arith.constant dense<0.000000e+00> : vector<16x8xf32>
    %8 = tpu.matmul %7, %1, %cst {dimension_numbers = #tpu.dot_dimension_numbers<[1], [0], [0], [1], [0, 0, 1, 1], [], []>} : vector<16x12xf32>, vector<12x8xf32>, vector<16x8xf32> -> vector<16x8xf32>
    %9 = vector.broadcast %2 : vector<1x8xf32> to vector<16x8xf32>
    %10 = arith.addf %8, %9 : vector<16x8xf32>
    %11 = vector.shape_cast %10 : vector<16x8xf32> to vector<1x16x8xf32>
    %c0_6 = arith.constant 0 : index
    %c0_7 = arith.constant 0 : index
    %c0_8 = arith.constant 0 : index
    %12 = vector.load %arg4[%c0_6, %c0_7, %c0_8] : memref<1x16x8xf32, #tpu.memory_space<vmem>>, vector<1x16x8xf32>
    tpu.vector_store %arg4[%c0_6, %c0_7, %c0_8], %11 {strides = array<i32>} : memref<1x16x8xf32, #tpu.memory_space<vmem>>, vector<1x16x8xf32>,
    return
  }
  func.func @transform_0(%arg0: i32) -> (i32, i32, i32) {
    %c0_i32 = arith.constant 0 : i32
    %c0_i32_0 = arith.constant 0 : i32
    %c0_i32_1 = arith.constant 0 : i32
    return %arg0, %c0_i32, %c0_i32_0 : i32, i32, i32
  }
  func.func @transform_1(%arg0: i32) -> (i32, i32) {
    %c0_i32 = arith.constant 0 : i32
    %c0_i32_0 = arith.constant 0 : i32
    %c0_i32_1 = arith.constant 0 : i32
    return %c0_i32, %c0_i32_0 : i32, i32
  }
  func.func @transform_2(%arg0: i32) -> (i32, i32) {
    %c0_i32 = arith.constant 0 : i32
    %c0_i32_0 = arith.constant 0 : i32
    %c0_i32_1 = arith.constant 0 : i32
    return %c0_i32, %c0_i32_0 : i32, i32
  }
  func.func @transform_3(%arg0: i32) -> (i32, i32, i32) {
    %c0_i32 = arith.constant 0 : i32
    %c0_i32_0 = arith.constant 0 : i32
    %c0_i32_1 = arith.constant 0 : i32
    return %arg0, %c0_i32, %c0_i32_0 : i32, i32, i32
  }
}

</mosaic_0001>

<bundles_post_ra>
// kernel: tpu_custom_call.1
= control target key start
LH: loop header
LB: loop body
LE: loop exit
PB: predicated region body
PF: predicated region fallthrough
CT: control target
= control target key end

     0   :  { %s434_s12 = smov 0   ;;  %s468_s0 = inlined_call_operand.vmem [shape: f32[2,18,4], index: 0, kind: input, shape index: {}]   ;;  %s469_s1 = inlined_call_operand.vmem [shape: f32[12,8], index: 1, kind: input, shape index: {}]   ;;  %s470_s2 = inlined_call_operand.vmem [shape: f32[1,8], index: 2, kind: input, shape index: {}]   ;;  %s471_s3 = inlined_call_operand.vmem [shape: f32[2,16,8], index: 3, kind: output, shape index: {}]  }
   0x1 LB: > { %s359_s13 = sadd.s32 4294967295, %s409_s12   ;;  %p363_p0 = scmp.ge.s32.totalorder %s409_s12, 1  ;;  %s409_s12 = sphi %s434_s12, %s13_s12  }
   0x2   : > { %p137_p1 = scmp.lt.s32.totalorder %s409_s12, 3 }
   0x4   : > { %p138_p2 = pnand %p363_p0, %p137_p1 }
   0x5   : > { %p161_p3 = scmp.lt.s32.totalorder (!%p138_p2), %s359_s13, 1  ;;  %v174_v0 = vld [vmem:[%s469_s1] sm:$0xff] (!%p138_p2)  ;;  %v175_v1 = vld [vmem:[%s469_s1 + $0x8] sm:$0xf] (!%p138_p2)  ;;  %vm223_vm0 = vcmask (!%p138_p2), 1043456   ;;  %vm411_vm1 = vmmov (!%p138_p2), 1  }
   0x6   : > { %141 = sbr.rel (%p138_p2) target bundleno = 358 (0x166), region = 32  ;;  %v385_v2 = vpack.c.bf16 (!%p138_p2), %v175_v1, %v174_v0  ;;  %vm386_vm2 = vmpackc.low (!%p138_p2), %vm223_vm0, %vm411_vm1  ;;  %vm180_vm3 = vcmask (!%p138_p2), 1046528   ;;  %vm192_vm4 = vcmask (!%p138_p2), 1045504   ;;  %s412_s22 = smov (!%p138_p2), 4   ;;  %vm204_vm5 = vcmask (!%p138_p2), 31744  }
   0x7   : > { %s413_s23 = smov (!%p138_p2), 8   ;;  %vm207_vm6 = vcmask (!%p138_p2), 64512   ;;  %vm216_vm7 = vcmask (!%p138_p2), 97280   ;;  %v367_v24 = vld [vmem:[%s470_s2] ss:$0 sm:$0xff] (!%p138_p2) }
   0x8   : > { %387 = vmatprep.subr.msk.bf16.mxu0 (!%p138_p2), %vm386_vm2, %v385_v2 }
   0x9   : > { %390 = vmatpush3.bf16.msk.msra.mxu0 (!%p138_p2), %vm386_vm2, %v385_v2 }
   0xd   : > { %s473_s13 = smov (!%p161_p3, %s359_s13), 1 }
   0xe   : > { %s391_s18 = smul.u32 24, %s473_s13  ;;  %s373_s24 = sshll.u32 %s473_s13, 4 }
   0xf   : > { %s170_s29 = scalar_lea.vmem %s471_s3, %s373_s24 }
  0x10   : > { %s165_s21 = scalar_lea.vmem %s468_s0, %s391_s18 }
  0x11   : > { %v171_v3 = vld [vmem:[%s165_s21] sm:$0xff]  ;;  %v172_v4 = vld [vmem:[%s165_s21 + $0x8] sm:$0xff]  ;;  %v173_v5 = vld [vmem:[%s165_s21 + $0x10] sm:$0x3] }
  0x12   : > { %v181_v6 = vrot.slane %v171_v3, 1  ;;  %v182_v7 = vrot.slane %v172_v4, 1  ;;  %v193_v8 = vrot.slane %v171_v3, 2  ;;  %v194_v9 = vrot.slane %v172_v4, 2 }
  0x13   : > { %v184_v10 = vrot.slane %v173_v5, 1  ;;  %v196_v11 = vrot.slane %v173_v5, 2 }
  0x14   : > { %v183_v12 = vsel %vm180_vm3, %v181_v6, %v182_v7  ;;  %v195_v13 = vsel %vm192_vm4, %v193_v8, %v194_v9 }
  0x15   : > { %186 = vrot.lane.b32.xlu0 %v183_v12, %s412_s22  ;;  %198 = vrot.lane.b32.xlu1 %v195_v13, %s413_s23  ;;  %v185_v14 = vsel %vm180_vm3, %v182_v7, %v184_v10  ;;  %v197_v15 = vsel %vm192_vm4, %v194_v9, %v196_v11 }
  0x19   : > { %188 = vrot.lane.b32.xlu0 %v185_v14, %s412_s22  ;;  %200 = vrot.lane.b32.xlu1 %v197_v15, %s413_s23 }
  0x87   : > { %v187_v16 = vpop.permute.xlu0 %186  ;;  %v199_v17 = vpop.permute.xlu1 %198 }
  0x88   : > { %v205_v18 = vsel %vm204_vm5, %v171_v3, %v187_v16 }
  0x89   : > { %v208_v19 = vsel %vm207_vm6, %v205_v18, %v199_v17 }
  0x8a   : > { %382 = vmatprep.mubr.msk.f32.mxu0 %vm216_vm7, %v208_v19 }
  0x8b   : > { %v189_v20 = vpop.permute.xlu0 %188  ;;  %v201_v21 = vpop.permute.xlu1 %200 }
  0x8c   : > { %v206_v22 = vsel %vm204_vm5, %v172_v4, %v189_v20 }
  0x8d   : > { %v209_v23 = vsel %vm207_vm6, %v206_v22, %v201_v21 }
  0x8e   : > { %383 = vmatmul.mubr.msk.f32.vlgmr.msra.gmra.mrb[0].mxu0 %vm216_vm7, %v209_v23 }
 0x161   : > { %v384_v25 = vpop.f32.mrb[0].mxu0 }
 0x162   : > { %v299_v26 = vadd.f32 %v384_v25, %v367_v24  ;;  %v293_v27 = vpop.f32.mrb[1].mxu0 }
 0x163   : > { %v294_v28 = vadd.f32 %v367_v24, %v293_v27 }
 0x164   : > { %303 = vst.msk [vmem:[%s170_s29 + $0x8] sm:$0xff] %vm207_vm6, %v299_v26 }
 0x165   : > { %302 = vst.msk [vmem:[%s170_s29] sm:$0xff] %vm207_vm6, %v294_v28 }
 0x166 PF: > { %s13_s12 = sadd.s32 1, %s409_s12  }
 0x167   : > { %p10_p4 = scmp.ge.s32.totalorder %s13_s12, 4  }
 0x169   :  { %12 = sbr.rel (!%p10_p4) target bundleno = 1 (0x1), region = 62 }

</bundles_post_ra>
